<compile_context>
chip_gen: v7x
topology: tpu7x:2x2x1
jax: 0.10.0
libtpu: 0.0.40
codegen_flags: <defaults>
</compile_context>

<pallas_src>
import functools

import jax
import jax.numpy as jnp
from jax.experimental import pallas as pl
from jax.experimental.pallas import tpu as pltpu


_VMEM_LIMIT = 48 * 1024 * 1024        # explicit scoped-VMEM limit (v7x default is 32 MiB)
_VMEM_TILE_BUDGET = 32 * 1024 * 1024  # target for the double-buffered working set


def _round_up(x, m):
    return (x + m - 1) // m * m


def _pair(v):
    return (v, v) if isinstance(v, int) else tuple(v)


def _choose_tile_m(M, K, Cp, in_itemsize, out_itemsize):
    """Pick an M tile that keeps both passes' double-buffered tiles under budget."""
    row_a = 2 * (K * in_itemsize + Cp * 4)      # pass A: patches in + f32 y out
    row_b = 2 * (Cp * 4 + Cp * out_itemsize)    # pass B: f32 y in + out
    t = _VMEM_TILE_BUDGET // max(row_a, row_b)
    t = max(8, min(2048, t))
    t = min(t, _round_up(M, 8))
    return max(8, (int(t) // 8) * 8)


# ----------------- pass A: conv matmul + BN batch-stat accumulation -----------------
def _conv_stats_kernel(p_ref, w_ref, y_ref, sum_ref, sq_ref):
    @pl.when(pl.program_id(0) == 0)
    def _():
        sum_ref[...] = jnp.zeros_like(sum_ref)
        sq_ref[...] = jnp.zeros_like(sq_ref)

    # MXU matmul in the native input dtype; f32 accumulation.
    y = jnp.dot(p_ref[...], w_ref[...], preferred_element_type=jnp.float32)
    y_ref[...] = y

    # Per-channel partials for train-mode BatchNorm.  Zero-padded rows (M padding)
    # contribute exactly zero to both sums, so the statistics stay exact.
    sum_ref[...] += jnp.sum(y, axis=0, keepdims=True)
    sq_ref[...] += jnp.sum(y * y, axis=0, keepdims=True)


# ----------------- pass B: fused normalization affine (y * scale + shift) -----------
def _bn_apply_kernel(y_ref, scale_ref, shift_ref, o_ref):
    o_ref[...] = (y_ref[...] * scale_ref[...] + shift_ref[...]).astype(o_ref.dtype)


@functools.partial(
    jax.jit, static_argnames=("stride", "padding", "dilation", "eps", "tile_m"))
def conv_norm2d(x, weight, bias, gamma, beta, *, stride=1, padding=0,
                dilation=1, eps=1e-5, tile_m=None):
    """PyTorch-equivalent ConvNorm2d forward (groups=1, padding_mode='zeros',
    BatchNorm2d in training mode)."""
    # TODO(synk): groups != 1 and padding_mode != 'zeros' are not implemented.
    del bias  # exact no-op: train-mode BatchNorm's mean subtraction cancels the bias.
    N, Cin, H, W = x.shape
    Cout, Cin_w, KH, KW = weight.shape
    assert Cin == Cin_w, "groups != 1 not supported"
    sh, sw = _pair(stride)
    ph, pw = _pair(padding)
    dh, dw = _pair(dilation)
    Hout = (H + 2 * ph - dh * (KH - 1) - 1) // sh + 1
    Wout = (W + 2 * pw - dw * (KW - 1) - 1) // sw + 1

    # --- glue: NCHW -> NHWC, zero pad, im2col via shifted slices ---
    # TODO(synk): for large Cin, accumulate per-(kh,kw)-tap [tile_M,Cin]@[Cin,Cout]
    # matmuls instead of materializing im2col (removes the KH*KW x HBM inflation).
    # TODO(synk): accept/produce NHWC at the boundary to drop the two transposes.
    x_nhwc = jnp.transpose(x, (0, 2, 3, 1))
    x_pad = jnp.pad(x_nhwc, ((0, 0), (ph, ph), (pw, pw), (0, 0)))
    cols = []
    for kh in range(KH):
        for kw in range(KW):
            h0, w0 = kh * dh, kw * dw
            patch = x_pad[:, h0:h0 + (Hout - 1) * sh + 1:sh,
                             w0:w0 + (Wout - 1) * sw + 1:sw, :]
            cols.append(patch)
    # column order: ((kh*KW + kw)*Cin + cin)
    M = N * Hout * Wout
    K = KH * KW * Cin
    patches = jnp.concatenate(cols, axis=-1).reshape(M, K)

    # Lane-dense channel axis: pad Cout (and per-channel params) to a multiple of 128.
    Cp = _round_up(Cout, 128)
    w2 = jnp.transpose(weight, (2, 3, 1, 0)).reshape(K, Cout)
    w2 = jnp.pad(w2, ((0, 0), (0, Cp - Cout)))
    g2 = jnp.pad(gamma.reshape(1, Cout), ((0, 0), (0, Cp - Cout))).astype(jnp.float32)
    be2 = jnp.pad(beta.reshape(1, Cout), ((0, 0), (0, Cp - Cout))).astype(jnp.float32)

    out_dtype = x.dtype
    tm = tile_m if tile_m is not None else _choose_tile_m(
        M, K, Cp, patches.dtype.itemsize, jnp.dtype(out_dtype).itemsize)
    tm = max(8, (int(tm) // 8) * 8)
    grid_m = pl.cdiv(M, tm)
    M_pad = grid_m * tm
    if M_pad != M:
        patches = jnp.pad(patches, ((0, M_pad - M), (0, 0)))

    # ---- pass A: tiled MXU matmul + per-channel sum / sum-of-squares ----
    y2d, csum, csq = pl.pallas_call(
        _conv_stats_kernel,
        out_shape=(
            jax.ShapeDtypeStruct((M_pad, Cp), jnp.float32),
            jax.ShapeDtypeStruct((1, Cp), jnp.float32),
            jax.ShapeDtypeStruct((1, Cp), jnp.float32),
        ),
        grid=(grid_m,),
        in_specs=[
            pl.BlockSpec((tm, K), lambda i: (i, 0)),
            pl.BlockSpec((K, Cp), lambda i: (0, 0)),
        ],
        out_specs=(
            pl.BlockSpec((tm, Cp), lambda i: (i, 0)),
            pl.BlockSpec((1, Cp), lambda i: (0, 0)),
            pl.BlockSpec((1, Cp), lambda i: (0, 0)),
        ),
        compiler_params=pltpu.CompilerParams(
            dimension_semantics=("arbitrary",),   # resident sum/sumsq accumulators
            vmem_limit_bytes=_VMEM_LIMIT),
    )(patches, w2)

    # ---- per-channel scale/shift (tiny (1, Cp) math, plain JAX) ----
    cnt = jnp.float32(M)                         # padded rows contributed exactly zero
    mean = csum / cnt
    var = jnp.maximum(csq / cnt - mean * mean, 0.0)   # biased var (training-mode BN)
    scale = g2 * jax.lax.rsqrt(var + eps)
    shift = be2 - mean * scale

    # ---- pass B: fused affine, normalized in place when dtypes match ----
    aliases = {0: 0} if jnp.dtype(out_dtype) == jnp.float32 else {}
    out2d = pl.pallas_call(
        _bn_apply_kernel,
        out_shape=jax.ShapeDtypeStruct((M_pad, Cp), out_dtype),
        grid=(grid_m,),
        in_specs=[
            pl.BlockSpec((tm, Cp), lambda i: (i, 0)),
            pl.BlockSpec((1, Cp), lambda i: (0, 0)),
            pl.BlockSpec((1, Cp), lambda i: (0, 0)),
        ],
        out_specs=pl.BlockSpec((tm, Cp), lambda i: (i, 0)),
        input_output_aliases=aliases,
        compiler_params=pltpu.CompilerParams(
            dimension_semantics=("parallel",),    # shard M tiles across TCs on v7x
            vmem_limit_bytes=_VMEM_LIMIT),
    )(y2d, scale, shift)

    # (M_pad, Cp) -> (N, Hout, Wout, Cout) -> NCHW
    return out2d[:M, :Cout].reshape(N, Hout, Wout, Cout).transpose(0, 3, 1, 2)


def _reference(x, weight, bias, gamma, beta, *, stride, padding, dilation, eps):
    sh, sw = _pair(stride)
    ph, pw = _pair(padding)
    dh, dw = _pair(dilation)
    y = jax.lax.conv_general_dilated(
        x, weight, window_strides=(sh, sw), padding=[(ph, ph), (pw, pw)],
        rhs_dilation=(dh, dw), dimension_numbers=("NCHW", "OIHW", "NCHW"))
    y = y + bias[None, :, None, None]
    mean = jnp.mean(y, axis=(0, 2, 3), keepdims=True)
    var = jnp.mean((y - mean) ** 2, axis=(0, 2, 3), keepdims=True)
    y = (y - mean) * jax.lax.rsqrt(var + eps)
    return y * gamma[None, :, None, None] + beta[None, :, None, None]


if __name__ == "__main__":
    # Small shapes consistent with the module: N=2, Cin=4, H=W=16, Cout=8, k=3, pad=1.
    N, Cin, H, W = 2, 4, 16, 16
    Cout, KH, KW = 8, 3, 3
    stride, padding, dilation, eps = 1, 1, 1, 1e-5

    key = jax.random.PRNGKey(0)
    kx, kw, kb = jax.random.split(key, 3)
    x = jax.random.normal(kx, (N, Cin, H, W), jnp.float32)
    # Deterministic parameter init (Conv2d weight/bias; BatchNorm2d gamma=1, beta=0).
    fan_in = Cin * KH * KW
    weight = jax.random.uniform(kw, (Cout, Cin, KH, KW), jnp.float32,
                                minval=-1.0, maxval=1.0) / jnp.sqrt(fan_in)
    bias = jax.random.uniform(kb, (Cout,), jnp.float32,
                              minval=-1.0, maxval=1.0) / jnp.sqrt(fan_in)
    gamma = jnp.ones((Cout,), jnp.float32)
    beta = jnp.zeros((Cout,), jnp.float32)

    # Force a small M tile so the test exercises the multi-tile accumulator path
    # (M = 512 -> 4 grid steps).  Production callers leave tile_m=None.
    out = conv_norm2d(x, weight, bias, gamma, beta,
                      stride=stride, padding=padding, dilation=dilation,
                      eps=eps, tile_m=128)
    out = jax.block_until_ready(out)

    ref = _reference(x, weight, bias, gamma, beta,
                     stride=stride, padding=padding, dilation=dilation, eps=eps)
    assert out.shape == (N, Cout, H, W), out.shape
    assert jnp.allclose(out, ref, atol=1e-4, rtol=1e-4), float(jnp.max(jnp.abs(out - ref)))

    print("KERNEL_OK")
</pallas_src>

<mosaic_0001>
module attributes {stable_mosaic.version = 11 : i64} {
  func.func @_conv_stats_kernel(%arg0: i32, %arg1: memref<128x36xf32, #tpu.memory_space<vmem>>, %arg2: memref<36x128xf32, #tpu.memory_space<vmem>>, %arg3: memref<128x128xf32, #tpu.memory_space<vmem>>, %arg4: memref<1x128xf32, #tpu.memory_space<vmem>>, %arg5: memref<1x128xf32, #tpu.memory_space<vmem>>) attributes {dimension_semantics = [#tpu.dimension_semantics<arbitrary>], iteration_bounds = array<i64: 4>, scalar_prefetch = 0 : i64, scratch_operands = 0 : i64, tpu.core_type = #tpu.core_type<tc>, window_params = [{transform_indices = @transform_0, window_bounds = array<i64: 128, 36>}, {pipeline_mode = #tpu.pipeline_mode<synchronous>, transform_indices = @transform_1, window_bounds = array<i64: 36, 128>}, {transform_indices = @transform_2, window_bounds = array<i64: 128, 128>}, {pipeline_mode = #tpu.pipeline_mode<synchronous>, transform_indices = @transform_3, window_bounds = array<i64: 1, 128>}, {pipeline_mode = #tpu.pipeline_mode<synchronous>, transform_indices = @transform_4, window_bounds = array<i64: 1, 128>}]} {
    %c0_i32 = arith.constant 0 : i32
    %0 = arith.cmpi eq, %arg0, %c0_i32 : i32
    %1 = arith.extui %0 : i1 to i32
    %c0_i32_0 = arith.constant 0 : i32
    %2 = arith.cmpi ne, %1, %c0_i32_0 : i32
    scf.if %2 {
      %cst_16 = arith.constant 0.000000e+00 : f32
      %18 = vector.broadcast %cst_16 : f32 to vector<1x128xf32>
      %c0_17 = arith.constant 0 : index
      %c0_18 = arith.constant 0 : index
      %19 = vector.load %arg4[%c0_17, %c0_18] : memref<1x128xf32, #tpu.memory_space<vmem>>, vector<1x128xf32>
      tpu.vector_store %arg4[%c0_17, %c0_18], %18 {strides = array<i32>} : memref<1x128xf32, #tpu.memory_space<vmem>>, vector<1x128xf32>,
      %cst_19 = arith.constant 0.000000e+00 : f32
      %20 = vector.broadcast %cst_19 : f32 to vector<1x128xf32>
      %c0_20 = arith.constant 0 : index
      %c0_21 = arith.constant 0 : index
      %21 = vector.load %arg5[%c0_20, %c0_21] : memref<1x128xf32, #tpu.memory_space<vmem>>, vector<1x128xf32>
      tpu.vector_store %arg5[%c0_20, %c0_21], %20 {strides = array<i32>} : memref<1x128xf32, #tpu.memory_space<vmem>>, vector<1x128xf32>,
    } else {
    }
    %c0 = arith.constant 0 : index
    %c0_1 = arith.constant 0 : index
    %3 = vector.load %arg1[%c0, %c0_1] : memref<128x36xf32, #tpu.memory_space<vmem>>, vector<128x36xf32>
    %c0_2 = arith.constant 0 : index
    %c0_3 = arith.constant 0 : index
    %4 = vector.load %arg2[%c0_2, %c0_3] : memref<36x128xf32, #tpu.memory_space<vmem>>, vector<36x128xf32>
    %cst = arith.constant dense<0.000000e+00> : vector<128x128xf32>
    %5 = tpu.matmul %3, %4, %cst {dimension_numbers = #tpu.dot_dimension_numbers<[1], [0], [0], [1], [0, 0, 1, 1], [], []>} : vector<128x36xf32>, vector<36x128xf32>, vector<128x128xf32> -> vector<128x128xf32>
    %c0_4 = arith.constant 0 : index
    %c0_5 = arith.constant 0 : index
    %6 = vector.load %arg3[%c0_4, %c0_5] : memref<128x128xf32, #tpu.memory_space<vmem>>, vector<128x128xf32>
    tpu.vector_store %arg3[%c0_4, %c0_5], %5 {strides = array<i32>} : memref<128x128xf32, #tpu.memory_space<vmem>>, vector<128x128xf32>,
    %c0_6 = arith.constant 0 : index
    %c0_7 = arith.constant 0 : index
    %7 = vector.load %arg4[%c0_6, %c0_7] : memref<1x128xf32, #tpu.memory_space<vmem>>, vector<1x128xf32>
    %cst_8 = arith.constant dense<0.000000e+00> : vector<128xf32>
    %8 = vector.multi_reduction <add>, %5, %cst_8 [0] : vector<128x128xf32> to vector<128xf32>
    %9 = vector.shape_cast %8 : vector<128xf32> to vector<1x128xf32>
    %10 = arith.addf %7, %9 : vector<1x128xf32>
    %c0_9 = arith.constant 0 : index
    %c0_10 = arith.constant 0 : index
    %11 = vector.load %arg4[%c0_9, %c0_10] : memref<1x128xf32, #tpu.memory_space<vmem>>, vector<1x128xf32>
    tpu.vector_store %arg4[%c0_9, %c0_10], %10 {strides = array<i32>} : memref<1x128xf32, #tpu.memory_space<vmem>>, vector<1x128xf32>,
    %c0_11 = arith.constant 0 : index
    %c0_12 = arith.constant 0 : index
    %12 = vector.load %arg5[%c0_11, %c0_12] : memref<1x128xf32, #tpu.memory_space<vmem>>, vector<1x128xf32>
    %13 = arith.mulf %5, %5 : vector<128x128xf32>
    %cst_13 = arith.constant dense<0.000000e+00> : vector<128xf32>
    %14 = vector.multi_reduction <add>, %13, %cst_13 [0] : vector<128x128xf32> to vector<128xf32>
    %15 = vector.shape_cast %14 : vector<128xf32> to vector<1x128xf32>
    %16 = arith.addf %12, %15 : vector<1x128xf32>
    %c0_14 = arith.constant 0 : index
    %c0_15 = arith.constant 0 : index
    %17 = vector.load %arg5[%c0_14, %c0_15] : memref<1x128xf32, #tpu.memory_space<vmem>>, vector<1x128xf32>
    tpu.vector_store %arg5[%c0_14, %c0_15], %16 {strides = array<i32>} : memref<1x128xf32, #tpu.memory_space<vmem>>, vector<1x128xf32>,
    return
  }
  func.func @transform_0(%arg0: i32) -> (i32, i32) {
    %c0_i32 = arith.constant 0 : i32
    %c0_i32_0 = arith.constant 0 : i32
    return %arg0, %c0_i32 : i32, i32
  }
  func.func @transform_1(%arg0: i32) -> (i32, i32) {
    %c0_i32 = arith.constant 0 : i32
    %c0_i32_0 = arith.constant 0 : i32
    %c0_i32_1 = arith.constant 0 : i32
    return %c0_i32, %c0_i32_0 : i32, i32
  }
  func.func @transform_2(%arg0: i32) -> (i32, i32) {
    %c0_i32 = arith.constant 0 : i32
    %c0_i32_0 = arith.constant 0 : i32
    return %arg0, %c0_i32 : i32, i32
  }
  func.func @transform_3(%arg0: i32) -> (i32, i32) {
    %c0_i32 = arith.constant 0 : i32
    %c0_i32_0 = arith.constant 0 : i32
    %c0_i32_1 = arith.constant 0 : i32
    return %c0_i32, %c0_i32_0 : i32, i32
  }
  func.func @transform_4(%arg0: i32) -> (i32, i32) {
    %c0_i32 = arith.constant 0 : i32
    %c0_i32_0 = arith.constant 0 : i32
    %c0_i32_1 = arith.constant 0 : i32
    return %c0_i32, %c0_i32_0 : i32, i32
  }
}

module attributes {stable_mosaic.version = 11 : i64} {
  func.func @_bn_apply_kernel(%arg0: i32, %arg1: memref<128x128xf32, #tpu.memory_space<vmem>>, %arg2: memref<1x128xf32, #tpu.memory_space<vmem>>, %arg3: memref<1x128xf32, #tpu.memory_space<vmem>>, %arg4: memref<128x128xf32, #tpu.memory_space<vmem>>) attributes {dimension_semantics = [#tpu.dimension_semantics<parallel>], iteration_bounds = array<i64: 4>, scalar_prefetch = 0 : i64, scratch_operands = 0 : i64, tpu.core_type = #tpu.core_type<tc>, window_params = [{transform_indices = @transform_0, window_bounds = array<i64: 128, 128>}, {pipeline_mode = #tpu.pipeline_mode<synchronous>, transform_indices = @transform_1, window_bounds = array<i64: 1, 128>}, {pipeline_mode = #tpu.pipeline_mode<synchronous>, transform_indices = @transform_2, window_bounds = array<i64: 1, 128>}, {transform_indices = @transform_3, window_bounds = array<i64: 128, 128>}]} {
    %c0 = arith.constant 0 : index
    %c0_0 = arith.constant 0 : index
    %0 = vector.load %arg1[%c0, %c0_0] : memref<128x128xf32, #tpu.memory_space<vmem>>, vector<128x128xf32>
    %c0_1 = arith.constant 0 : index
    %c0_2 = arith.constant 0 : index
    %1 = vector.load %arg2[%c0_1, %c0_2] : memref<1x128xf32, #tpu.memory_space<vmem>>, vector<1x128xf32>
    %2 = vector.broadcast %1 : vector<1x128xf32> to vector<128x128xf32>
    %3 = arith.mulf %0, %2 : vector<128x128xf32>
    %c0_3 = arith.constant 0 : index
    %c0_4 = arith.constant 0 : index
    %4 = vector.load %arg3[%c0_3, %c0_4] : memref<1x128xf32, #tpu.memory_space<vmem>>, vector<1x128xf32>
    %5 = vector.broadcast %4 : vector<1x128xf32> to vector<128x128xf32>
    %6 = arith.addf %3, %5 : vector<128x128xf32>
    %c0_5 = arith.constant 0 : index
    %c0_6 = arith.constant 0 : index
    %7 = vector.load %arg4[%c0_5, %c0_6] : memref<128x128xf32, #tpu.memory_space<vmem>>, vector<128x128xf32>
    tpu.vector_store %arg4[%c0_5, %c0_6], %6 {strides = array<i32>} : memref<128x128xf32, #tpu.memory_space<vmem>>, vector<128x128xf32>,
    return
  }
  func.func @transform_0(%arg0: i32) -> (i32, i32) {
    %c0_i32 = arith.constant 0 : i32
    %c0_i32_0 = arith.constant 0 : i32
    return %arg0, %c0_i32 : i32, i32
  }
  func.func @transform_1(%arg0: i32) -> (i32, i32) {
    %c0_i32 = arith.constant 0 : i32
    %c0_i32_0 = arith.constant 0 : i32
    %c0_i32_1 = arith.constant 0 : i32
    return %c0_i32, %c0_i32_0 : i32, i32
  }
  func.func @transform_2(%arg0: i32) -> (i32, i32) {
    %c0_i32 = arith.constant 0 : i32
    %c0_i32_0 = arith.constant 0 : i32
    %c0_i32_1 = arith.constant 0 : i32
    return %c0_i32, %c0_i32_0 : i32, i32
  }
  func.func @transform_3(%arg0: i32) -> (i32, i32) {
    %c0_i32 = arith.constant 0 : i32
    %c0_i32_0 = arith.constant 0 : i32
    return %arg0, %c0_i32 : i32, i32
  }
}

</mosaic_0001>

<bundles_post_ra>
// kernel: conv_norm2d.3
= control target key start
LH: loop header
LB: loop body
LE: loop exit
PB: predicated region body
PF: predicated region fallthrough
CT: control target
= control target key end

     0   :  { %s357_s12 = smov 0   ;;  %s416_s0 = inlined_call_operand.vmem [shape: f32[512,128], index: 0, kind: input, shape index: {}, may-alias: {0,3}]   ;;  %s417_s1 = inlined_call_operand.vmem [shape: f32[1,128], index: 1, kind: input, shape index: {}]   ;;  %s418_s2 = inlined_call_operand.vmem [shape: f32[1,128], index: 2, kind: input, shape index: {}]   ;;  %s419_s3 = inlined_call_operand.vmem [shape: f32[512,128], index: 3, kind: output, shape index: {}, may-alias: {0,3}]  }
   0x1 LB: > { %s308_s13 = sadd.s32 4294967295, %s335_s12   ;;  %p312_p0 = scmp.ge.s32.totalorder %s335_s12, 1  ;;  %s335_s12 = sphi %s357_s12, %s13_s12  }
   0x2   : > { %p138_p1 = scmp.lt.s32.totalorder %s335_s12, 5 }
   0x4   : > { %p139_p2 = pnand %p312_p0, %p138_p1 }
   0x5   : > { %s313_s14 = sshll.u32 (!%p139_p2), %s308_s13, 4  ;;  %v317_v0 = vld [vmem:[%s417_s1] ss:$0 sm:$0xff] (!%p139_p2) }
   0x6   : > { %142 = sbr.rel (%p139_p2) target bundleno = 32 (0x20), region = 32  ;;  %p163_p3 = scmp.lt.s32.totalorder (!%p139_p2), %s313_s14, 63  ;;  %v318_v1 = vld [vmem:[%s418_s2] ss:$0 sm:$0xff] (!%p139_p2) }
   0xd   : > { %s421_s14 = smov (!%p163_p3, %s313_s14), 63 }
   0xe   : > { %s314_s15 = sshll.u32 %s421_s14, 3 }
   0xf   : > { %s371_s20 = scalar_lea.vmem %s416_s0, %s314_s15  ;;  %s388_s25 = scalar_lea.vmem %s419_s3, %s314_s15 }
  0x10   : > { %v174_v2 = vld [vmem:[%s371_s20] sm:$0xff]  ;;  %v175_v3 = vld [vmem:[%s371_s20 + $0x8] sm:$0xff]  ;;  %v176_v4 = vld [vmem:[%s371_s20 + $0x10] sm:$0xff] }
  0x11   : > { %v177_v5 = vld [vmem:[%s371_s20 + $0x18] sm:$0xff]  ;;  %v178_v6 = vld [vmem:[%s371_s20 + $0x20] sm:$0xff]  ;;  %v179_v7 = vld [vmem:[%s371_s20 + $0x28] sm:$0xff]  ;;  %v197_v8 = vmul.f32 %v317_v0, %v174_v2  ;;  %v198_v9 = vmul.f32 %v317_v0, %v175_v3  ;;  %v199_v10 = vmul.f32 %v317_v0, %v176_v4 }
  0x12   : > { %v180_v11 = vld [vmem:[%s371_s20 + $0x30] sm:$0xff]  ;;  %v181_v12 = vld [vmem:[%s371_s20 + $0x38] sm:$0xff]  ;;  %v182_v13 = vld [vmem:[%s371_s20 + $0x40] sm:$0xff]  ;;  %v200_v14 = vmul.f32 %v317_v0, %v177_v5  ;;  %v201_v15 = vmul.f32 %v317_v0, %v178_v6  ;;  %v202_v16 = vmul.f32 %v317_v0, %v179_v7 }
  0x13   : > { %v183_v17 = vld [vmem:[%s371_s20 + $0x48] sm:$0xff]  ;;  %v184_v18 = vld [vmem:[%s371_s20 + $0x50] sm:$0xff]  ;;  %v185_v19 = vld [vmem:[%s371_s20 + $0x58] sm:$0xff]  ;;  %v203_v20 = vmul.f32 %v317_v0, %v180_v11  ;;  %v204_v21 = vmul.f32 %v317_v0, %v181_v12  ;;  %v205_v22 = vmul.f32 %v317_v0, %v182_v13  ;;  %v220_v23 = vadd.f32 %v318_v1, %v197_v8 }
  0x14   : > { %v186_v24 = vld [vmem:[%s371_s20 + $0x60] sm:$0xff]  ;;  %v187_v25 = vld [vmem:[%s371_s20 + $0x68] sm:$0xff]  ;;  %v188_v26 = vld [vmem:[%s371_s20 + $0x70] sm:$0xff]  ;;  %v206_v27 = vmul.f32 %v317_v0, %v183_v17  ;;  %v207_v28 = vmul.f32 %v317_v0, %v184_v18  ;;  %v208_v29 = vmul.f32 %v317_v0, %v185_v19  ;;  %v221_v30 = vadd.f32 %v318_v1, %v198_v9 }
  0x15   : > { %v189_v31 = vld [vmem:[%s371_s20 + $0x78] sm:$0xff]  ;;  %v209_v32 = vmul.f32 %v317_v0, %v186_v24  ;;  %v210_v33 = vmul.f32 %v317_v0, %v187_v25  ;;  %v211_v34 = vmul.f32 %v317_v0, %v188_v26  ;;  %v222_v35 = vadd.f32 %v318_v1, %v199_v10 }
  0x16   : > { %v212_v36 = vmul.f32 %v317_v0, %v189_v31  ;;  %v223_v37 = vadd.f32 %v318_v1, %v200_v14  ;;  %v224_v38 = vadd.f32 %v318_v1, %v201_v15  ;;  %v225_v39 = vadd.f32 %v318_v1, %v202_v16  ;;  %236 = vst [vmem:[%s388_s25] sm:$0xff] %v220_v23 }
  0x17   : > { %237 = vst [vmem:[%s388_s25 + $0x8] sm:$0xff] %v221_v30  ;;  %v226_v40 = vadd.f32 %v318_v1, %v203_v20  ;;  %v227_v41 = vadd.f32 %v318_v1, %v204_v21  ;;  %v228_v42 = vadd.f32 %v318_v1, %v205_v22  ;;  %v229_v43 = vadd.f32 %v318_v1, %v206_v27 }
  0x18   : > { %238 = vst [vmem:[%s388_s25 + $0x10] sm:$0xff] %v222_v35  ;;  %v230_v44 = vadd.f32 %v318_v1, %v207_v28  ;;  %v231_v45 = vadd.f32 %v318_v1, %v208_v29  ;;  %v232_v46 = vadd.f32 %v318_v1, %v209_v32  ;;  %v233_v47 = vadd.f32 %v318_v1, %v210_v33 }
  0x19   : > { %239 = vst [vmem:[%s388_s25 + $0x18] sm:$0xff] %v223_v37  ;;  %240 = vst [vmem:[%s388_s25 + $0x20] sm:$0xff] %v224_v38  ;;  %v234_v48 = vadd.f32 %v318_v1, %v211_v34  ;;  %v235_v49 = vadd.f32 %v318_v1, %v212_v36 }
  0x1a   : > { %241 = vst [vmem:[%s388_s25 + $0x28] sm:$0xff] %v225_v39  ;;  %242 = vst [vmem:[%s388_s25 + $0x30] sm:$0xff] %v226_v40 }
  0x1b   : > { %243 = vst [vmem:[%s388_s25 + $0x38] sm:$0xff] %v227_v41  ;;  %244 = vst [vmem:[%s388_s25 + $0x40] sm:$0xff] %v228_v42 }
  0x1c   : > { %245 = vst [vmem:[%s388_s25 + $0x48] sm:$0xff] %v229_v43  ;;  %246 = vst [vmem:[%s388_s25 + $0x50] sm:$0xff] %v230_v44 }
  0x1d   : > { %247 = vst [vmem:[%s388_s25 + $0x58] sm:$0xff] %v231_v45  ;;  %248 = vst [vmem:[%s388_s25 + $0x60] sm:$0xff] %v232_v46 }
  0x1e   : > { %249 = vst [vmem:[%s388_s25 + $0x68] sm:$0xff] %v233_v47  ;;  %250 = vst [vmem:[%s388_s25 + $0x70] sm:$0xff] %v234_v48 }
  0x1f   : > { %251 = vst [vmem:[%s388_s25 + $0x78] sm:$0xff] %v235_v49 }
  0x20 PF: > { %s13_s12 = sadd.s32 1, %s335_s12  }
  0x21   : > { %p10_p4 = scmp.ge.s32.totalorder %s13_s12, 6  }
  0x23   :  { %12 = sbr.rel (!%p10_p4) target bundleno = 1 (0x1), region = 62 }

// kernel: conv_norm2d.2
= control target key start
LH: loop header
LB: loop body
LE: loop exit
PB: predicated region body
PF: predicated region fallthrough
CT: control target
= control target key end

     0   :  { %s710_s15 = smov 0   ;;  %s812_s0 = inlined_call_operand.vmem [shape: f32[512,36], index: 0, kind: input, shape index: {}]   ;;  %s813_s1 = inlined_call_operand.vmem [shape: f32[36,128], index: 1, kind: input, shape index: {}]   ;;  %s814_s2 = inlined_call_operand.vmem [shape: f32[512,128], index: 2, kind: output, shape index: {0}]   ;;  %s815_s3 = inlined_call_operand.vmem [shape: f32[1,128], index: 3, kind: output, shape index: {1}]   ;;  %s816_s4 = inlined_call_operand.vmem [shape: f32[1,128], index: 4, kind: output, shape index: {2}]  }
   0x1 LB: > { %s569_s16 = sadd.s32 4294967295, %s682_s15   ;;  %p573_p0 = scmp.ge.s32.totalorder %s682_s15, 1  ;;  %s682_s15 = sphi %s710_s15, %s15_s15  }
   0x2   : > { %p158_p1 = scmp.lt.s32.totalorder %s682_s15, 5 }
   0x4   : > { %p159_p2 = pnand %p573_p0, %p158_p1 }
   0x5   : > { %s574_s17 = sshll.u32 (!%p159_p2), %s569_s16, 4  ;;  %p578_p4 = scmp.ne.s32.totalorder (!%p159_p2), %s569_s16, 0 }
   0x6   : > { %162 = sbr.rel (%p159_p2) target bundleno = 295 (0x127), region = 28  ;;  %p185_p3 = scmp.lt.s32.totalorder (!%p159_p2), %s574_s17, 63 }
   0xd   : > { %s818_s17 = smov (!%p185_p3, %s574_s17), 63  ;;  %199 = sbr.rel (%p578_p4) target bundleno = 20 (0x14), region = 32 }
   0xe   : > { %s575_s18 = sshll.u32 %s818_s17, 3  ;;  %v684_v0 = vmov (!%p578_p4), 0.0  }
   0xf   : > { %s721_s21 = scalar_lea.vmem %s812_s0, %s575_s18  ;;  %s726_s24 = scalar_lea.vmem %s814_s2, %s575_s18  ;;  %200 = vst [vmem:[%s815_s3] sm:$0x1] (!%p578_p4), %v684_v0  ;;  %201 = vst [vmem:[%s816_s4] sm:$0x1] (!%p578_p4), %v684_v0 }
  0x14 PF: > { %v218_v1 = vld [vmem:[%s813_s1] sm:$0xff]  ;;  %v219_v2 = vld [vmem:[%s813_s1 + $0x8] sm:$0xff]  ;;  %v220_v3 = vld [vmem:[%s813_s1 + $0x10] sm:$0xff]  ;;  %vm223_vm0 = vcmask 293888   ;;  %vm272_vm1 = vcmask 1043456  }
  0x15   : > { %v653_v4 = vpack.c.bf16 %v219_v2, %v218_v1  ;;  %v221_v5 = vld [vmem:[%s813_s1 + $0x18] sm:$0xff]  ;;  %v202_v6 = vld [vmem:[%s721_s21] sm:$0xff]  ;;  %v203_v10 = vld [vmem:[%s721_s21 + $0x8] sm:$0xff] }
  0x16   : > { %v657_v7 = vpack.c.bf16 %v221_v5, %v220_v3  ;;  %629 = vmatprep.mubr.msk.f32.mxu0 %vm223_vm0, %v202_v6  ;;  %v210_v8 = vld [vmem:[%s721_s21 + $0x40] sm:$0xff]  ;;  %v211_v11 = vld [vmem:[%s721_s21 + $0x48] sm:$0xff]  ;;  %v204_v12 = vld [vmem:[%s721_s21 + $0x10] sm:$0xff] }
  0x17   : > { %654 = vmatprep.subr.bf16.mxu0 %v653_v4  ;;  %661 = vmatprep.subr.bf16.mxu1 %v653_v4  ;;  %v222_v9 = vld [vmem:[%s813_s1 + $0x20] sm:$0xf]  ;;  %v212_v13 = vld [vmem:[%s721_s21 + $0x50] sm:$0xff]  ;;  %v205_v14 = vld [vmem:[%s721_s21 + $0x18] sm:$0xff] }
  0x18   : > { %656 = vmatpush3.bf16.msra.mxu0 %v653_v4  ;;  %664 = vmatpush3.bf16.msra.mxu1 %v653_v4  ;;  %v213_v15 = vld [vmem:[%s721_s21 + $0x58] sm:$0xff]  ;;  %v206_v16 = vld [vmem:[%s721_s21 + $0x20] sm:$0xff]  ;;  %v207_v18 = vld [vmem:[%s721_s21 + $0x28] sm:$0xff] }
  0x19   : > { %658 = vmatprep.subr.bf16.mxu0 %v657_v7  ;;  %662 = vmatprep.subr.bf16.mxu1 %v657_v7  ;;  %v214_v17 = vld [vmem:[%s721_s21 + $0x60] sm:$0xff]  ;;  %v215_v19 = vld [vmem:[%s721_s21 + $0x68] sm:$0xff]  ;;  %v208_v20 = vld [vmem:[%s721_s21 + $0x30] sm:$0xff] }
  0x1a   : > { %641 = vmatprep.mubr.msk.f32.mxu1 %vm223_vm0, %v210_v8  ;;  %v216_v21 = vld [vmem:[%s721_s21 + $0x70] sm:$0xff]  ;;  %v209_v22 = vld [vmem:[%s721_s21 + $0x38] sm:$0xff] }
  0x1b   : > { %v217_v23 = vld [vmem:[%s721_s21 + $0x78] sm:$0xff] }
  0x1c   : > { %660 = vmatpush3.bf16.msra.mxu0 %v657_v7  ;;  %665 = vmatpush3.bf16.msra.mxu1 %v657_v7 }
  0x1d   : > { %627 = vmatprep.subr.msk.mxu0 %vm272_vm1, %v222_v9  ;;  %663 = vmatprep.subr.msk.mxu1 %vm272_vm1, %v222_v9 }
  0x20   : > { %628 = vmatpush3.msk.msra.mxu0 %vm272_vm1, %v222_v9  ;;  %666 = vmatpush3.msk.msra.mxu1 %vm272_vm1, %v222_v9 }
  0x21   : > { %630 = vmatmul.mubr.msk.f32.vlgmr.msra.gmra.mrb[0].mxu0 %vm223_vm0, %v203_v10  ;;  %642 = vmatmul.mubr.msk.f32.vlgmr.msra.gmra.mrb[0].mxu1 %vm223_vm0, %v211_v11 }
  0x22   : > { %632 = vmatprep.mubr.msk.f32.mxu0 %vm223_vm0, %v204_v12  ;;  %644 = vmatprep.mubr.msk.f32.mxu1 %vm223_vm0, %v212_v13 }
  0x25   : > { %633 = vmatmul.mubr.msk.f32.gmra.mrb[2].mxu0 %vm223_vm0, %v205_v14  ;;  %645 = vmatmul.mubr.msk.f32.gmra.mrb[2].mxu1 %vm223_vm0, %v213_v15 }
  0x26   : > { %635 = vmatprep.mubr.msk.f32.mxu0 %vm223_vm0, %v206_v16  ;;  %647 = vmatprep.mubr.msk.f32.mxu1 %vm223_vm0, %v214_v17 }
  0x29   : > { %636 = vmatmul.mubr.msk.f32.gmra.mrb[4].mxu0 %vm223_vm0, %v207_v18  ;;  %648 = vmatmul.mubr.msk.f32.gmra.mrb[4].mxu1 %vm223_vm0, %v215_v19 }
  0x2a   : > { %638 = vmatprep.mubr.msk.f32.mxu0 %vm223_vm0, %v208_v20  ;;  %650 = vmatprep.mubr.msk.f32.mxu1 %vm223_vm0, %v216_v21 }
  0x2d   : > { %639 = vmatmul.mubr.msk.f32.gmra.mrb[6].mxu0 %vm223_vm0, %v209_v22  ;;  %651 = vmatmul.mubr.msk.f32.gmra.mrb[6].mxu1 %vm223_vm0, %v217_v23 }
  0xf4   : > { %v631_v24 = vpop.f32.mrb[0].mxu0  ;;  %v643_v25 = vpop.f32.mrb[0].mxu1 }
  0xf5   : > { %422 = vst [vmem:[%s726_s24 + $0x8] sm:$0xff] %v631_v24  ;;  %v463_v26 = vmul.f32 %v631_v24, %v631_v24  ;;  %v342_v27 = vpop.f32.mrb[1].mxu0  ;;  %430 = vst [vmem:[%s726_s24 + $0x48] sm:$0xff] %v643_v25  ;;  %v382_v28 = vpop.f32.mrb[1].mxu1  ;;  %v471_v0 = vmul.f32 %v643_v25, %v643_v25 }
  0xf6   : > { %421 = vst [vmem:[%s726_s24] sm:$0xff] %v342_v27  ;;  %v438_v29 = vadd.f32 %v631_v24, %v342_v27  ;;  %v462_v30 = vmul.f32 %v342_v27, %v342_v27  ;;  %429 = vst [vmem:[%s726_s24 + $0x40] sm:$0xff] %v382_v28  ;;  %v470_v61 = vmul.f32 %v382_v28, %v382_v28 }
  0xf8   : > { %v478_v31 = vadd.f32 %v463_v26, %v462_v30  ;;  %v634_v32 = vpop.f32.mrb[2].mxu0  ;;  %v646_v33 = vpop.f32.mrb[2].mxu1 }
  0xf9   : > { %424 = vst [vmem:[%s726_s24 + $0x18] sm:$0xff] %v634_v32  ;;  %v352_v34 = vpop.f32.mrb[3].mxu0  ;;  %432 = vst [vmem:[%s726_s24 + $0x58] sm:$0xff] %v646_v33  ;;  %v392_v35 = vpop.f32.mrb[3].mxu1  ;;  %v465_v38 = vmul.f32 %v634_v32, %v634_v32  ;;  %v473_v6 = vmul.f32 %v646_v33, %v646_v33 }
  0xfa   : > { %423 = vst [vmem:[%s726_s24 + $0x10] sm:$0xff] %v352_v34  ;;  %v439_v36 = vadd.f32 %v438_v29, %v352_v34  ;;  %v464_v37 = vmul.f32 %v352_v34, %v352_v34  ;;  %431 = vst [vmem:[%s726_s24 + $0x50] sm:$0xff] %v392_v35  ;;  %v472_v3 = vmul.f32 %v392_v35, %v392_v35  ;;  %v461_v34 = vld [vmem:[%s816_s4] sm:$0x1] }
  0xfc   : > { %v479_v39 = vadd.f32 %v478_v31, %v464_v37  ;;  %v637_v40 = vpop.f32.mrb[4].mxu0  ;;  %v440_v41 = vadd.f32 %v634_v32, %v439_v36  ;;  %v649_v42 = vpop.f32.mrb[4].mxu1  ;;  %v437_v31 = vld [vmem:[%s815_s3] sm:$0x1] }
  0xfd   : > { %426 = vst [vmem:[%s726_s24 + $0x28] sm:$0xff] %v637_v40  ;;  %v362_v43 = vpop.f32.mrb[5].mxu0  ;;  %434 = vst [vmem:[%s726_s24 + $0x68] sm:$0xff] %v649_v42  ;;  %v402_v44 = vpop.f32.mrb[5].mxu1  ;;  %v467_v48 = vmul.f32 %v637_v40, %v637_v40  ;;  %v475_v12 = vmul.f32 %v649_v42, %v649_v42 }
  0xfe   : > { %425 = vst [vmem:[%s726_s24 + $0x20] sm:$0xff] %v362_v43  ;;  %v441_v45 = vadd.f32 %v440_v41, %v362_v43  ;;  %v466_v46 = vmul.f32 %v362_v43, %v362_v43  ;;  %v480_v47 = vadd.f32 %v479_v39, %v465_v38  ;;  %433 = vst [vmem:[%s726_s24 + $0x60] sm:$0xff] %v402_v44 }
  0xff   : > { %v474_v9 = vmul.f32 %v402_v44, %v402_v44 }
 0x100   : > { %v481_v49 = vadd.f32 %v480_v47, %v466_v46  ;;  %v640_v50 = vpop.f32.mrb[6].mxu0  ;;  %v442_v51 = vadd.f32 %v637_v40, %v441_v45  ;;  %v652_v52 = vpop.f32.mrb[6].mxu1 }
 0x101   : > { %428 = vst [vmem:[%s726_s24 + $0x38] sm:$0xff] %v640_v50  ;;  %v372_v53 = vpop.f32.mrb[7].mxu0  ;;  %436 = vst [vmem:[%s726_s24 + $0x78] sm:$0xff] %v652_v52  ;;  %v412_v54 = vpop.f32.mrb[7].mxu1  ;;  %v469_v58 = vmul.f32 %v640_v50, %v640_v50  ;;  %v477_v18 = vmul.f32 %v652_v52, %v652_v52 }
 0x102   : > { %427 = vst [vmem:[%s726_s24 + $0x30] sm:$0xff] %v372_v53  ;;  %v443_v55 = vadd.f32 %v442_v51, %v372_v53  ;;  %v468_v56 = vmul.f32 %v372_v53, %v372_v53  ;;  %v482_v57 = vadd.f32 %v481_v49, %v467_v48  ;;  %435 = vst [vmem:[%s726_s24 + $0x70] sm:$0xff] %v412_v54 }
 0x103   : > { %v476_v15 = vmul.f32 %v412_v54, %v412_v54 }
 0x104   : > { %v444_v59 = vadd.f32 %v640_v50, %v443_v55  ;;  %v483_v60 = vadd.f32 %v482_v57, %v468_v56 }
 0x106   : > { %v484_v62 = vadd.f32 %v483_v60, %v469_v58  ;;  %v445_v63 = vadd.f32 %v444_v59, %v382_v28 }
 0x108   : > { %v485_v1 = vadd.f32 %v484_v62, %v470_v61  ;;  %v446_v2 = vadd.f32 %v643_v25, %v445_v63 }
 0x10a   : > { %v447_v4 = vadd.f32 %v446_v2, %v392_v35  ;;  %v486_v5 = vadd.f32 %v485_v1, %v471_v0 }
 0x10c   : > { %v487_v7 = vadd.f32 %v486_v5, %v472_v3  ;;  %v448_v8 = vadd.f32 %v646_v33, %v447_v4 }
 0x10e   : > { %v449_v10 = vadd.f32 %v448_v8, %v402_v44  ;;  %v488_v11 = vadd.f32 %v487_v7, %v473_v6 }
 0x110   : > { %v489_v13 = vadd.f32 %v488_v11, %v474_v9  ;;  %v450_v14 = vadd.f32 %v649_v42, %v449_v10 }
 0x112   : > { %v451_v16 = vadd.f32 %v450_v14, %v412_v54  ;;  %v490_v17 = vadd.f32 %v489_v13, %v475_v12 }
 0x114   : > { %v452_v19 = vadd.f32 %v652_v52, %v451_v16  ;;  %v491_v20 = vadd.f32 %v490_v17, %v476_v15 }
 0x116   : > { %v453_v21 = vrot.slane %v452_v19, 4  ;;  %v492_v22 = vadd.f32 %v491_v20, %v477_v18 }
 0x118   : > { %v454_v23 = vadd.f32 %v453_v21, %v452_v19  ;;  %v493_v24 = vrot.slane %v492_v22, 4 }
 0x11a   : > { %v455_v25 = vrot.slane %v454_v23, 2  ;;  %v494_v26 = vadd.f32 %v493_v24, %v492_v22 }
 0x11c   : > { %v456_v27 = vadd.f32 %v455_v25, %v454_v23  ;;  %v495_v28 = vrot.slane %v494_v26, 2 }
 0x11e   : > { %v457_v29 = vrot.slane %v456_v27, 1  ;;  %v496_v30 = vadd.f32 %v495_v28, %v494_v26 }
 0x120   : > { %v458_v32 = vadd.f32 %v457_v29, %v456_v27  ;;  %v497_v33 = vrot.slane %v496_v30, 1 }
 0x122   : > { %v459_v35 = vadd.f32 %v458_v32, %v437_v31  ;;  %v498_v36 = vadd.f32 %v497_v33, %v496_v30 }
 0x124   : > { %460 = vst [vmem:[%s815_s3] sm:$0x1] %v459_v35  ;;  %v499_v37 = vadd.f32 %v498_v36, %v461_v34 }
 0x126   : > { %500 = vst [vmem:[%s816_s4] sm:$0x1] %v499_v37 }
 0x127 PF: > { %s15_s15 = sadd.s32 1, %s682_s15  }
 0x128   : > { %p12_p5 = scmp.ge.s32.totalorder %s15_s15, 6  }
 0x12a   :  { %14 = sbr.rel (!%p12_p5) target bundleno = 1 (0x1), region = 78 }

</bundles_post_ra>
